<compile_context>
chip_gen: v7x
topology: tpu7x:2x2x1
jax: 0.10.0
libtpu: 0.0.40
codegen_flags: <defaults>
</compile_context>

<pallas_src>
import functools

import numpy as np

import jax
import jax.numpy as jnp
from jax.experimental import pallas as pl
from jax.experimental.pallas import tpu as pltpu


def _uniform_noise_kernel(noise_ref, x_ref, o_ref):
    # noise_ref: (1, TF), broadcast over the batch (sublane) dim; x_ref: (TB, TF).
    x = x_ref[...]
    o_ref[...] = x * noise_ref[...] + x


def _generation_params():
    """(target_block_bytes, vmem_limit_bytes), sized per TPU generation."""
    vmem_bytes = None
    try:
        vmem_bytes = getattr(pltpu.get_tpu_info(), "vmem_capacity_bytes", None)
    except Exception:
        vmem_bytes = None
    if vmem_bytes is None:
        vmem_bytes = 64 * 1024 * 1024  # conservative default
    if vmem_bytes <= 64 * 1024 * 1024:
        # v7x-class: 64 MiB/core -> ~4 MiB blocks, live set well under 48 MiB.
        return 4 * 1024 * 1024, 48 * 1024 * 1024
    # v5e / v6e: 128 MiB physical -> bigger blocks; the explicit limit is
    # required on v5e whose default scoped VMEM is only 16 MiB.
    return 8 * 1024 * 1024, 64 * 1024 * 1024


def _choose_tiles(n, feat, itemsize, target_bytes):
    """Pick (batch_tile, feature_tile) for the (N, F) view."""
    sub = max(8, 32 // itemsize)            # dtype-aware sublane multiple
    lane_feat = pl.cdiv(feat, 128) * 128    # feature dim rounded up to lanes

    # Feature (lane) tile: multiple of 128, sized so `sub` batch rows fill the budget.
    if feat >= 128:
        budget_tf = max(128, ((target_bytes // (sub * itemsize)) // 128) * 128)
        tf = min(lane_feat, budget_tf)
    else:
        tf = feat                           # tiny feature dim: full (masked) lane tile

    # Batch (sublane) tile: multiple of `sub`, or the whole batch when it is small.
    if n <= sub:
        tb = n
    else:
        rows_budget = max(sub, target_bytes // (tf * itemsize))
        tb = min((rows_budget // sub) * sub, pl.cdiv(n, sub) * sub)
        tb = max(tb, sub)

    # Guarantee >= 2 grid steps so a "parallel" axis can feed both v7x
    # TensorCores, while keeping block shapes legal (lane tiles stay x128,
    # sublane tiles stay multiples of `sub` or the full dim).
    if pl.cdiv(feat, tf) * pl.cdiv(n, tb) < 2:
        if feat >= 256:
            tf = pl.cdiv(pl.cdiv(feat, 2), 128) * 128
        elif n >= 2 * sub:
            tb = pl.cdiv(pl.cdiv(n, 2), sub) * sub
    return tb, tf


@functools.partial(
    jax.jit, static_argnames=("noise_min", "noise_max", "min_pallas_bytes"))
def uniform_noise_decoder(x, y, key, noise_min=-0.3, noise_max=0.3,
                          min_pallas_bytes=2 * 1024 * 1024):
    """Pallas implementation of UniformNoiseDecoder.forward.

    Returns (x * noise + x, y) with noise ~ U[noise_min, noise_max) of shape
    x.shape[1:], shared across the batch dimension (matches the torch module).
    """
    n = x.shape[0]
    feat = int(np.prod(x.shape[1:]))
    itemsize = jnp.dtype(x.dtype).itemsize

    # Noise shared across the batch; sampled in f32 (torch default), cast to x.dtype.
    noise = jax.random.uniform(key, shape=x.shape[1:], dtype=jnp.float32,
                               minval=noise_min, maxval=noise_max).astype(x.dtype)

    # Fast path: for tiny tensors the XLA fusion is already at roofline and the
    # kernel would be pure launch / pipeline-prologue overhead.
    if n * feat * itemsize < min_pallas_bytes:
        return x * noise + x, y

    target_block, vmem_limit = _generation_params()
    tb, tf = _choose_tiles(n, feat, itemsize, target_block)

    x2 = x.reshape(n, feat)          # contiguous reshape: no HBM copy
    noise2 = noise.reshape(1, feat)
    grid = (pl.cdiv(feat, tf), pl.cdiv(n, tb))   # feature outer, batch inner

    out2 = pl.pallas_call(
        _uniform_noise_kernel,
        out_shape=jax.ShapeDtypeStruct((n, feat), x.dtype),
        grid=grid,
        in_specs=[
            # Noise tile: block index is constant across the inner batch loop,
            # so the pipeline does not re-fetch it every step.
            pl.BlockSpec((1, tf), lambda j, i: (0, j)),
            # x tile.
            pl.BlockSpec((tb, tf), lambda j, i: (i, j)),
        ],
        out_specs=pl.BlockSpec((tb, tf), lambda j, i: (i, j)),
        # Write x in place when the caller donates x (no extra HBM allocation).
        input_output_aliases={1: 0},
        cost_estimate=pl.CostEstimate(
            flops=2 * n * feat,
            transcendentals=0,
            bytes_accessed=(2 * n * feat + feat) * itemsize),
        compiler_params=pltpu.CompilerParams(
            dimension_semantics=("parallel", "parallel"),
            vmem_limit_bytes=vmem_limit),
    )(noise2, x2)

    return out2.reshape(x.shape), y


if __name__ == "__main__":
    key = jax.random.PRNGKey(0)
    kx1, kx2, ky, kn1, kn2 = jax.random.split(key, 5)

    # Case 1: lane-aligned feature size (4*16*16 = 1024).
    x1 = jax.random.normal(kx1, (2, 4, 16, 16), dtype=jnp.float32)
    y1 = jax.random.randint(ky, (2,), 0, 10, dtype=jnp.int32)
    out1, y1_out = uniform_noise_decoder(x1, y1, kn1, min_pallas_bytes=0)
    jax.block_until_ready(out1)
    jax.block_until_ready(y1_out)

    noise1 = jax.random.uniform(kn1, shape=x1.shape[1:], dtype=jnp.float32,
                                minval=-0.3, maxval=0.3).astype(x1.dtype)
    exp1 = x1 * noise1 + x1
    np.testing.assert_allclose(np.asarray(out1), np.asarray(exp1),
                               rtol=1e-5, atol=1e-6)
    assert np.array_equal(np.asarray(y1_out), np.asarray(y1))

    # Noise within [-0.3, 0.3) and shared across the batch dimension.
    xo, xn = np.asarray(out1), np.asarray(x1)
    ratio = np.where(np.abs(xn) > 1e-6, xo / xn - 1.0, 0.0)
    assert ratio.min() >= -0.3 - 1e-4 and ratio.max() <= 0.3 + 1e-4
    mask = (np.abs(xn[0]) > 1e-6) & (np.abs(xn[1]) > 1e-6)
    assert np.allclose(ratio[0][mask], ratio[1][mask], atol=1e-4)

    # Case 2: non-128-divisible feature size (3*14*14 = 588) -> exercises the
    # masked final lane tile without any padded HBM copies.
    x2 = jax.random.normal(kx2, (2, 3, 14, 14), dtype=jnp.float32)
    out2, _ = uniform_noise_decoder(x2, y1, kn2, min_pallas_bytes=0)
    jax.block_until_ready(out2)
    noise2 = jax.random.uniform(kn2, shape=x2.shape[1:], dtype=jnp.float32,
                                minval=-0.3, maxval=0.3).astype(x2.dtype)
    exp2 = x2 * noise2 + x2
    np.testing.assert_allclose(np.asarray(out2), np.asarray(exp2),
                               rtol=1e-5, atol=1e-6)

    print("KERNEL_OK")
</pallas_src>

<mosaic_0001>
module attributes {stable_mosaic.version = 11 : i64} {
  func.func @_uniform_noise_kernel(%arg0: i32, %arg1: i32, %arg2: memref<1x512xf32, #tpu.memory_space<vmem>>, %arg3: memref<2x512xf32, #tpu.memory_space<vmem>>, %arg4: memref<2x512xf32, #tpu.memory_space<vmem>>) attributes {dimension_semantics = [#tpu.dimension_semantics<parallel>, #tpu.dimension_semantics<parallel>], iteration_bounds = array<i64: 2, 1>, scalar_prefetch = 0 : i64, scratch_operands = 0 : i64, tpu.core_type = #tpu.core_type<tc>, window_params = [{transform_indices = @transform_0, window_bounds = array<i64: 1, 512>}, {transform_indices = @transform_1, window_bounds = array<i64: 2, 512>}, {transform_indices = @transform_2, window_bounds = array<i64: 2, 512>}]} {
    %c0 = arith.constant 0 : index
    %c0_0 = arith.constant 0 : index
    %0 = vector.load %arg3[%c0, %c0_0] : memref<2x512xf32, #tpu.memory_space<vmem>>, vector<2x512xf32>
    %c0_1 = arith.constant 0 : index
    %c0_2 = arith.constant 0 : index
    %1 = vector.load %arg2[%c0_1, %c0_2] : memref<1x512xf32, #tpu.memory_space<vmem>>, vector<1x512xf32>
    %2 = vector.broadcast %1 : vector<1x512xf32> to vector<2x512xf32>
    %3 = arith.mulf %0, %2 : vector<2x512xf32>
    %4 = arith.addf %3, %0 : vector<2x512xf32>
    %c0_3 = arith.constant 0 : index
    %c0_4 = arith.constant 0 : index
    %5 = vector.load %arg4[%c0_3, %c0_4] : memref<2x512xf32, #tpu.memory_space<vmem>>, vector<2x512xf32>
    tpu.vector_store %arg4[%c0_3, %c0_4], %4 {strides = array<i32>} : memref<2x512xf32, #tpu.memory_space<vmem>>, vector<2x512xf32>,
    return
  }
  func.func @transform_0(%arg0: i32, %arg1: i32) -> (i32, i32) {
    %c0_i32 = arith.constant 0 : i32
    %c0_i32_0 = arith.constant 0 : i32
    return %c0_i32, %arg0 : i32, i32
  }
  func.func @transform_1(%arg0: i32, %arg1: i32) -> (i32, i32) {
    %c0_i32 = arith.constant 0 : i32
    return %arg1, %arg0 : i32, i32
  }
  func.func @transform_2(%arg0: i32, %arg1: i32) -> (i32, i32) {
    %c0_i32 = arith.constant 0 : i32
    return %arg1, %arg0 : i32, i32
  }
}

</mosaic_0001>

<bundles_post_ra>
// kernel: uniform_noise_decoder.1
= control target key start
LH: loop header
LB: loop body
LE: loop exit
PB: predicated region body
PF: predicated region fallthrough
CT: control target
= control target key end

     0   :  { %s415_s9 = smov 0   ;;  %s417_s10 = smov 0   ;;  %s451_s0 = inlined_call_operand.vmem [shape: f32[1,1024], index: 0, kind: input, shape index: {}]   ;;  %s452_s1 = inlined_call_operand.vmem [shape: f32[2,1024], index: 1, kind: input, shape index: {}, may-alias: {1,2}]   ;;  %s453_s2 = inlined_call_operand.vmem [shape: f32[2,1024], index: 2, kind: output, shape index: {}, may-alias: {1,2}]  }
   0x1   :  { %s419_s11 = smov 0  }
   0x2 LB: > { %s24_s12 = sadd.s32 1, %s393_s10  ;;  %p342_p0 = scmp.ge.s32.totalorder %s397_s11, 1  ;;  %s397_s11 = sphi %s419_s11, %s12_s11   ;;  %s393_s10 = sphi %s417_s10, %s455_s10   ;;  %s389_s9 = sphi %s415_s9, %s454_s9  }
   0x3   : > { %p26_p1 = scmp.ge.s32.totalorder %s24_s12, 2  ;;  %p143_p2 = scmp.lt.s32.totalorder %s397_s11, 3 }
   0x5   : > { %s457_s12 = smov (%p26_p1, %s24_s12), 0  ;;  %p144_p3 = pnand %p342_p0, %p143_p2 }
   0x6   : > { %s343_s13 = sshll.u32 (!%p144_p3), %s389_s9, 2  ;;  %v205_v0 = vlaneseq (!%p144_p3)  ;;  %v399_v1 = vmov (!%p144_p3), 1983009808  }
   0x7   : > { %147 = sbr.rel (%p144_p3) target bundleno = 30 (0x1e), region = 28  ;;  %p178_p4 = scmp.lt.s32.totalorder (!%p144_p3), %s343_s13, 7  ;;  %v224_v2 = vunpack.c.l.s4 (!%p144_p3), %v399_v1 }
   0x8   : > { %v206_v3 = vshrl.u32 (!%p144_p3), %v205_v0, 7 }
   0x9   : > { %v225_v4 = vunpack.c.0.s8 (!%p144_p3), %v224_v2 }
   0xa   : > { %v207_v5 = vsub.s32 (!%p144_p3), 0, %v206_v3  ;;  %v211_v6 = vsub.s32 (!%p144_p3), 1, %v206_v3  ;;  %v215_v7 = vsub.s32 (!%p144_p3), 2, %v206_v3  ;;  %v219_v8 = vsub.s32 (!%p144_p3), 3, %v206_v3 }
   0xb   : > { %v228_v10 = vsub.s32 (!%p144_p3), %v225_v4, %v206_v3 }
   0xe   : > { %s459_s13 = smov (!%p178_p4, %s343_s13), 7 }
   0xf   : > { %s180_s16 = scalar_lea.vmem %s451_s0, %s459_s13  ;;  %s345_s17 = sshll.u32 %s459_s13, 1 }
  0x10   : > { %v203_v9 = vld [vmem:[%s180_s16] sm:$0xf]  ;;  %s190_s20 = scalar_lea.vmem %s452_s1, %s345_s17  ;;  %s200_s23 = scalar_lea.vmem %s453_s2, %s345_s17 }
  0x11   : > { %v208_v11 = vrot.slane %v203_v9, %v207_v5  ;;  %v212_v12 = vrot.slane %v203_v9, %v211_v6  ;;  %v216_v13 = vrot.slane %v203_v9, %v215_v7  ;;  %v220_v14 = vrot.slane %v203_v9, %v219_v8  ;;  %v202_v19 = vld [vmem:[%s190_s20] sm:$0xff] }
  0x13   : > { %v221_v15 = vcombine.low %v208_v11, %v212_v12  ;;  %v222_v16 = vcombine.low %v216_v13, %v220_v14 }
  0x15   : > { %v229_v17 = vrot.slane %v221_v15, %v228_v10  ;;  %v236_v18 = vrot.slane %v222_v16, %v228_v10 }
  0x17   : > { %v237_v20 = vcombine.low %v229_v17, %v236_v18 }
  0x19   : > { %v239_v21 = vmul.f32 %v237_v20, %v202_v19 }
  0x1b   : > { %v240_v22 = vadd.f32 %v239_v21, %v202_v19 }
  0x1d   : > { %241 = vst [vmem:[%s200_s23] sm:$0xff] %v240_v22 }
  0x1e PF: > { %s12_s11 = sadd.s32 1, %s397_s11   ;;  %s454_s9 = smov %s393_s10 }
  0x1f   : > { %p9_p5 = scmp.ge.s32.totalorder %s12_s11, 4   ;;  %s455_s10 = smov %s457_s12 }
  0x21   :  { %11 = sbr.rel (!%p9_p5) target bundleno = 2 (0x2), region = 61 }

</bundles_post_ra>
